<compile_context>
chip_gen: v5e
topology: v5e:2x2
jax: 0.10.0
libtpu: 0.0.40
codegen_flags: <defaults>
</compile_context>

<pallas_src>
import math

import jax
import jax.numpy as jnp
from jax import lax
from jax.experimental import pallas as pl
from jax.experimental.pallas import tpu as pltpu


def _round_up(x, m):
    return ((x + m - 1) // m) * m


# ----------------------------- Pallas kernel --------------------------------
def _gconv3d_mm_kernel(w_ref, b_ref, x_ref, o_ref):
    # w_ref : (Cout_pad, K)        bf16  (K = Cin*kY*kX*kT, full im2col contraction)
    # b_ref : (Cout_pad, 1)        f32
    # x_ref : (1, K, P_pad)        bf16  (im2col patches, P lane-dense)
    # o_ref : (1, Cout_pad, P_pad) f32
    acc = jnp.dot(w_ref[...], x_ref[0], preferred_element_type=jnp.float32)
    o_ref[0] = (acc + b_ref[...]).astype(o_ref.dtype)


def make_gconv3d_forward(weights, bias_vec, *, compute_dtype=jnp.bfloat16):
    """Build a jitted forward for a fixed (group-expanded) weight set.

    weights:  (Cout, Cin, kY, kX, kT) f32   -- output of build_group_weights
    bias_vec: (Cout,)                 f32
    Returns forward(x): (N, Cin, Y, X, T) f32 -> (N, Cout, Yo, Xo, To) f32.
    """
    Cout, Cin, kY, kX, kT = weights.shape
    K = Cin * kY * kX * kT

    # --- packed parameters, hoisted out of the per-call hot path -----------
    Cout_pad = _round_up(Cout, 8)                 # full-sublane acc, unmasked stores
    w2 = weights.reshape(Cout, K).astype(compute_dtype)
    w2 = jnp.pad(w2, ((0, Cout_pad - Cout), (0, 0)))               # (Cout_pad, K)
    b2 = jnp.pad(bias_vec.reshape(Cout, 1).astype(jnp.float32),
                 ((0, Cout_pad - Cout), (0, 0)))                   # (Cout_pad, 1)

    @jax.jit
    def forward(x):
        N, Cin_x, Y, X, T = x.shape
        assert Cin_x == Cin
        Yo, Xo, To = Y - kY + 1, X - kX + 1, T - kT + 1
        P = Yo * Xo * To
        P_pad = _round_up(P, 128)                 # lane-dense output tiles

        # --- wrapper-side im2col (layout plumbing only; fused under jit) ---
        # Cast to bf16 BEFORE the tap expansion so the duplicated slab is
        # built and written in bf16.
        x_b = x.astype(compute_dtype)
        taps = []
        for ky in range(kY):
            for kx in range(kX):
                for kt in range(kT):
                    taps.append(x_b[:, :, ky:ky + Yo, kx:kx + Xo, kt:kt + To])
        # (N, Cin, S, Yo, Xo, To) -> (N, K, P); K order (cin, ky, kx, kt)
        # matches weights.reshape(Cout, K).
        patches = jnp.stack(taps, axis=2).reshape(N, K, P)
        if P_pad != P:
            patches = jnp.pad(patches, ((0, 0), (0, 0), (0, P_pad - P)))

        # One grid step per batch element: a full (K, P_pad) lane-dense block
        # per step (minimal pipeline overhead) while keeping >= 2 "parallel"
        # grid points for v7x's two TensorCores / megacore sharding.
        # VMEM per step ~ 2*(K*P_pad*2B) + 2*(Cout_pad*P_pad*4B) + weights
        # ~= 0.5 MiB at these shapes -- far under every generation's budget.
        out_flat = pl.pallas_call(
            _gconv3d_mm_kernel,
            out_shape=jax.ShapeDtypeStruct((N, Cout_pad, P_pad), jnp.float32),
            grid_spec=pltpu.PrefetchScalarGridSpec(
                num_scalar_prefetch=0,
                grid=(N,),
                in_specs=[
                    pl.BlockSpec((Cout_pad, K), lambda n: (0, 0)),     # weights (resident)
                    pl.BlockSpec((Cout_pad, 1), lambda n: (0, 0)),     # bias    (resident)
                    pl.BlockSpec((1, K, P_pad), lambda n: (n, 0, 0)),  # patch slab
                ],
                out_specs=pl.BlockSpec((1, Cout_pad, P_pad), lambda n: (n, 0, 0)),
            ),
            compiler_params=pltpu.CompilerParams(
                dimension_semantics=("parallel",),
                vmem_limit_bytes=32 * 1024 * 1024,
            ),
        )(w2, b2, patches)

        # Drop Cout / P padding; (N, Cout, P) is already NCDHW-flat.
        return out_flat[:, :Cout, :P].reshape(N, Cout, Yo, Xo, To)

    return forward


# ---------------------- GConv3d weight construction (glue) ------------------
def build_group_weights(W, B, rt_group_size=4):
    """Reproduces GConv3d.get_weight() for the non-Hermitian middle-layer case.

    W: (O, 1, Ci, G, kY, kX, kT) float32
    B: (1, O, 1, 1, 1) float32
    returns weights (O*G, Ci*G, kY, kX, kT), bias (1, O*G, 1, 1, 1)
    """
    O, _, Ci, G, kY, kX, kT = W.shape
    assert G == rt_group_size
    w_prev = W[:, 0]  # (O, Ci, G, kY, kX, kT)
    ws = [w_prev]
    for _ in range(1, rt_group_size):
        # weights[:, k] = weights[:, k-1].rot90(dims=[-3, -2])
        wk = jnp.rot90(ws[-1], k=1, axes=(-3, -2))
        # cyclic shift of the input-group axis: cat([last, :-1], dim=2)
        wk = jnp.roll(wk, shift=1, axis=2)
        ws.append(wk)
    weights = jnp.stack(ws, axis=1)               # (O, G, Ci, G, kY, kX, kT)
    weights = weights.reshape(O * G, Ci * G, kY, kX, kT)
    bias = jnp.repeat(B, G, axis=1)               # repeat_interleave along channel dim
    return weights, bias


if __name__ == "__main__":
    # Module hyper-params (small, consistent with GConv3d.__init__)
    in_channels, out_channels = 2, 3
    kernel_size, kernel_size_T = 3, 3
    G = 4  # rt_group_size, no reflection
    N, Y, X, T = 2, 10, 10, 10  # NCDHW input: (N, in_channels*G, Y, X, T)

    key = jax.random.PRNGKey(0)
    kW, kB, kx = jax.random.split(key, 3)

    # Deterministic kaiming_uniform-style init (a = sqrt(5) -> bound = 1/sqrt(fan_in))
    fan_in_W = 1 * in_channels * G * kernel_size * kernel_size * kernel_size_T
    bound_W = 1.0 / math.sqrt(fan_in_W)
    W = jax.random.uniform(
        kW,
        (out_channels, 1, in_channels, G, kernel_size, kernel_size, kernel_size_T),
        minval=-bound_W, maxval=bound_W, dtype=jnp.float32,
    )
    bound_B = 1.0 / math.sqrt(out_channels)
    B = jax.random.uniform(
        kB, (1, out_channels, 1, 1, 1),
        minval=-bound_B, maxval=bound_B, dtype=jnp.float32,
    )

    x = jax.random.normal(kx, (N, in_channels * G, Y, X, T), dtype=jnp.float32)

    # --- get_weight() equivalent (plain JAX glue, built once) ---
    weights, bias = build_group_weights(W, B, G)

    # --- forward() via jitted Pallas im2col-matmul kernel ---
    forward = make_gconv3d_forward(weights, bias.reshape(-1))
    out = jax.block_until_ready(forward(x))       # (N, O*G, Yo, Xo, To), NCDHW

    # Reference: the kernel feeds bf16 operands to the MXU with f32
    # accumulation, so compare against an XLA conv3d over identically
    # bf16-rounded operands (only f32 summation order differs).
    x_r = x.astype(jnp.bfloat16).astype(jnp.float32)
    w_r = weights.astype(jnp.bfloat16).astype(jnp.float32)
    ref = lax.conv_general_dilated(
        x_r, w_r, window_strides=(1, 1, 1), padding="VALID",
        dimension_numbers=("NCDHW", "OIDHW", "NCDHW"),
    ) + bias

    assert out.shape == (
        N, out_channels * G, Y - kernel_size + 1, X - kernel_size + 1,
        T - kernel_size_T + 1,
    ), out.shape
    assert jnp.allclose(out, ref, atol=1e-3, rtol=1e-3), float(jnp.max(jnp.abs(out - ref)))

    print("KERNEL_OK")
</pallas_src>

<mosaic_0001>
module attributes {stable_mosaic.version = 11 : i64} {
  func.func @_gconv3d_mm_kernel(%arg0: i32, %arg1: memref<16x216xbf16, #tpu.memory_space<vmem>>, %arg2: memref<16x1xf32, #tpu.memory_space<vmem>>, %arg3: memref<1x216x512xbf16, #tpu.memory_space<vmem>>, %arg4: memref<1x16x512xf32, #tpu.memory_space<vmem>>) attributes {dimension_semantics = [#tpu.dimension_semantics<parallel>], iteration_bounds = array<i64: 2>, scalar_prefetch = 0 : i64, scratch_operands = 0 : i64, tpu.core_type = #tpu.core_type<tc>, window_params = [{pipeline_mode = #tpu.pipeline_mode<synchronous>, transform_indices = @transform_0, window_bounds = array<i64: 16, 216>}, {pipeline_mode = #tpu.pipeline_mode<synchronous>, transform_indices = @transform_1, window_bounds = array<i64: 16, 1>}, {transform_indices = @transform_2, window_bounds = array<i64: 1, 216, 512>}, {transform_indices = @transform_3, window_bounds = array<i64: 1, 16, 512>}]} {
    %c0 = arith.constant 0 : index
    %c0_0 = arith.constant 0 : index
    %0 = vector.load %arg1[%c0, %c0_0] : memref<16x216xbf16, #tpu.memory_space<vmem>>, vector<16x216xbf16>
    %c0_1 = arith.constant 0 : index
    %c0_2 = arith.constant 0 : index
    %c0_3 = arith.constant 0 : index
    %1 = vector.load %arg3[%c0_1, %c0_2, %c0_3] : memref<1x216x512xbf16, #tpu.memory_space<vmem>>, vector<1x216x512xbf16>
    %2 = vector.shape_cast %1 : vector<1x216x512xbf16> to vector<216x512xbf16>
    %cst = arith.constant dense<0.000000e+00> : vector<16x512xf32>
    %3 = tpu.matmul %0, %2, %cst {dimension_numbers = #tpu.dot_dimension_numbers<[1], [0], [0], [1], [0, 0, 1, 1], [], []>} : vector<16x216xbf16>, vector<216x512xbf16>, vector<16x512xf32> -> vector<16x512xf32>
    %c0_4 = arith.constant 0 : index
    %c0_5 = arith.constant 0 : index
    %4 = vector.load %arg2[%c0_4, %c0_5] : memref<16x1xf32, #tpu.memory_space<vmem>>, vector<16x1xf32>
    %5 = vector.broadcast %4 : vector<16x1xf32> to vector<16x512xf32>
    %6 = arith.addf %3, %5 : vector<16x512xf32>
    %c0_6 = arith.constant 0 : index
    %c0_7 = arith.constant 0 : index
    %c0_8 = arith.constant 0 : index
    %7 = vector.load %arg4[%c0_6, %c0_7, %c0_8] : memref<1x16x512xf32, #tpu.memory_space<vmem>>, vector<1x16x512xf32>
    %8 = vector.shape_cast %7 : vector<1x16x512xf32> to vector<16x512xf32>
    %9 = vector.shape_cast %6 : vector<16x512xf32> to vector<1x16x512xf32>
    tpu.vector_store %arg4[%c0_6, %c0_7, %c0_8], %9 {strides = array<i32>} : memref<1x16x512xf32, #tpu.memory_space<vmem>>, vector<1x16x512xf32>,
    return
  }
  func.func @transform_0(%arg0: i32) -> (i32, i32) {
    %c0_i32 = arith.constant 0 : i32
    %c0_i32_0 = arith.constant 0 : i32
    %c0_i32_1 = arith.constant 0 : i32
    return %c0_i32, %c0_i32_0 : i32, i32
  }
  func.func @transform_1(%arg0: i32) -> (i32, i32) {
    %c0_i32 = arith.constant 0 : i32
    %c0_i32_0 = arith.constant 0 : i32
    %c0_i32_1 = arith.constant 0 : i32
    return %c0_i32, %c0_i32_0 : i32, i32
  }
  func.func @transform_2(%arg0: i32) -> (i32, i32, i32) {
    %c0_i32 = arith.constant 0 : i32
    %c0_i32_0 = arith.constant 0 : i32
    %c0_i32_1 = arith.constant 0 : i32
    return %arg0, %c0_i32, %c0_i32_0 : i32, i32, i32
  }
  func.func @transform_3(%arg0: i32) -> (i32, i32, i32) {
    %c0_i32 = arith.constant 0 : i32
    %c0_i32_0 = arith.constant 0 : i32
    %c0_i32_1 = arith.constant 0 : i32
    return %arg0, %c0_i32, %c0_i32_0 : i32, i32, i32
  }
}

</mosaic_0001>

<bundles_post_ra>
// kernel: forward.1
= control target key start
LH: loop header
LB: loop body
LE: loop exit
PB: predicated region body
PF: predicated region fallthrough
CT: control target
= control target key end

     0   :  { %s1036_s12 = smov 0   ;;  %s1213_s0 = inlined_call_operand.vmem [shape: bf16[16,216], index: 0, kind: input, shape index: {}]   ;;  %s1214_s1 = inlined_call_operand.vmem [shape: f32[16,1], index: 1, kind: input, shape index: {}]   ;;  %s1215_s2 = inlined_call_operand.vmem [shape: bf16[2,216,512], index: 2, kind: input, shape index: {}]   ;;  %s1216_s3 = inlined_call_operand.vmem [shape: f32[2,16,512], index: 3, kind: output, shape index: {}]  }
   0x1 LB: > { %s711_s13 = sadd.s32 4294967295, %s1013_s12   ;;  %p715_p0 = scmp.ge.s32.totalorder %s1013_s12, 1  ;;  %s1013_s12 = sphi %s1036_s12, %s13_s12  }
   0x2   : > { %p137_p1 = scmp.lt.s32.totalorder %s1013_s12, 3 }
   0x4   : > { %p138_p2 = pnand %p715_p0, %p137_p1 }
   0x5   : > { %p161_p3 = scmp.lt.s32.totalorder (!%p138_p2), %s711_s13, 1 }
   0x6   : > { %141 = sbr.rel (%p138_p2) target bundleno = 220 (0xdc), region = 32 }
   0xb   : > { %s1218_s13 = smov (!%p161_p3, %s711_s13), 1  ;;  %vm523_vm0 = vcmask 1043456   ;;  %vm519_vm1 = vcmask 719872  }
   0xc   : > { %s996_s14 = smul.u32 432, %s1218_s13  ;;  %s941_s30 = sshll.u32 %s1218_s13, 6 }
   0xd   : > { %s1200_s6 = scalar_lea.vmem %s1216_s3, %s941_s30 }
   0xe   : > { %s1050_s17 = scalar_lea.vmem %s1215_s2, %s996_s14 }
   0xf   : > { %v841_v0 = vld [vmem:[%s1050_s17 + $0xe0] sm:$0xf]  ;;  %v974_v1 = vld [vmem:[%s1050_s17 + $0xec] sm:$0xf0]  ;;  %v972_v2 = vld [vmem:[%s1050_s17 + $0xe4] sm:$0xf] }
  0x10   : > { %v842_v3 = vor.u32 %v974_v1, %v841_v0  ;;  %v843_v4 = vld [vmem:[%s1050_s17 + $0xf0] sm:$0xf0]  ;;  %v226_v5 = vld [vmem:[%s1050_s17 + $0x1a0] sm:$0xff]  ;;  %v970_v9 = vld [vmem:[%s1050_s17 + $0xcc] sm:$0xf0] }
  0x11   : > { %v825_v6 = vld [vmem:[%s1050_s17 + $0xc0] sm:$0xf]  ;;  %v846_v7 = vor.u32 %v972_v2, %v843_v4  ;;  %v407_v8 = vunpack.c.l.b16 %v226_v5  ;;  %v968_v10 = vld [vmem:[%s1050_s17 + $0xc4] sm:$0xf]  ;;  %v827_v11 = vld [vmem:[%s1050_s17 + $0xd0] sm:$0xf0]  ;;  %v408_v12 = vunpack.c.h.b16 %v226_v5 }
  0x12   : > { %536 = vmatpush.bf16.msra.mxu0 %v842_v3  ;;  %v826_v13 = vor.u32 %v970_v9, %v825_v6  ;;  %v921_v14 = vld [vmem:[%s1050_s17 + $0x180] sm:$0xf]  ;;  %v994_v15 = vld [vmem:[%s1050_s17 + $0x18c] sm:$0xf0]  ;;  %v830_v17 = vor.u32 %v968_v10, %v827_v11  ;;  %v964_v21 = vld [vmem:[%s1050_s17 + $0xa4] sm:$0xf] }
  0x13   : > { %564 = vmatpush.bf16.msra.mxu2 %v846_v7  ;;  %v463_v16 = vpack.c.b16 %v407_v8, %v407_v8  ;;  %v464_v18 = vpack.c.b16 %v408_v12, %v408_v12  ;;  %v809_v19 = vld [vmem:[%s1050_s17 + $0xa0] sm:$0xf]  ;;  %v966_v20 = vld [vmem:[%s1050_s17 + $0xac] sm:$0xf0]  ;;  %v811_v22 = vld [vmem:[%s1050_s17 + $0xb0] sm:$0xf0]  ;;  %v922_v27 = vor.u32 %v994_v15, %v921_v14 }
  0x14   : > { %v992_v23 = vld [vmem:[%s1050_s17 + $0x184] sm:$0xf]  ;;  %v923_v24 = vld [vmem:[%s1050_s17 + $0x190] sm:$0xf0]  ;;  %v810_v28 = vor.u32 %v966_v20, %v809_v19  ;;  %v905_v29 = vld [vmem:[%s1050_s17 + $0x160] sm:$0xf]  ;;  %v814_v31 = vor.u32 %v964_v21, %v811_v22 }
  0x15   : > { %v525_v25 = vsel %vm523_vm0, %v463_v16, 0  ;;  %v528_v26 = vsel %vm523_vm0, %v464_v18, 0  ;;  %v990_v30 = vld [vmem:[%s1050_s17 + $0x16c] sm:$0xf0]  ;;  %v926_v32 = vor.u32 %v992_v23, %v923_v24  ;;  %v793_v33 = vld [vmem:[%s1050_s17 + $0x80] sm:$0xf] }
  0x16   : > { %552 = vmatpush.bf16.msra.mxu1 %v525_v25  ;;  %537 = vmatpush.bf16.msra.mxu0 %v826_v13  ;;  %v962_v34 = vld [vmem:[%s1050_s17 + $0x8c] sm:$0xf0]  ;;  %v960_v35 = vld [vmem:[%s1050_s17 + $0x84] sm:$0xf]  ;;  %v795_v36 = vld [vmem:[%s1050_s17 + $0x90] sm:$0xf0]  ;;  %v906_v39 = vor.u32 %v990_v30, %v905_v29 }
  0x17   : > { %565 = vmatpush.bf16.msra.mxu2 %v830_v17  ;;  %580 = vmatpush.bf16.msra.mxu3 %v528_v26  ;;  %v988_v37 = vld [vmem:[%s1050_s17 + $0x164] sm:$0xf]  ;;  %v907_v38 = vld [vmem:[%s1050_s17 + $0x170] sm:$0xf0]  ;;  %v794_v40 = vor.u32 %v962_v34, %v793_v33  ;;  %v889_v41 = vld [vmem:[%s1050_s17 + $0x140] sm:$0xf]  ;;  %v798_v43 = vor.u32 %v960_v35, %v795_v36 }
  0x18   : > { %v986_v42 = vld [vmem:[%s1050_s17 + $0x14c] sm:$0xf0]  ;;  %v910_v44 = vor.u32 %v988_v37, %v907_v38  ;;  %v777_v45 = vld [vmem:[%s1050_s17 + $0x60] sm:$0xf]  ;;  %v956_v47 = vld [vmem:[%s1050_s17 + $0x64] sm:$0xf] }
  0x19   : > { %v958_v46 = vld [vmem:[%s1050_s17 + $0x6c] sm:$0xf0]  ;;  %v779_v48 = vld [vmem:[%s1050_s17 + $0x70] sm:$0xf0]  ;;  %v984_v49 = vld [vmem:[%s1050_s17 + $0x144] sm:$0xf]  ;;  %v890_v51 = vor.u32 %v986_v42, %v889_v41 }
  0x1a   : > { %553 = vmatpush.bf16.msra.mxu1 %v922_v27  ;;  %538 = vmatpush.bf16.msra.mxu0 %v810_v28  ;;  %v891_v50 = vld [vmem:[%s1050_s17 + $0x150] sm:$0xf0]  ;;  %v778_v52 = vor.u32 %v958_v46, %v777_v45  ;;  %v873_v53 = vld [vmem:[%s1050_s17 + $0x120] sm:$0xf]  ;;  %v982_v54 = vld [vmem:[%s1050_s17 + $0x12c] sm:$0xf0]  ;;  %v782_v56 = vor.u32 %v956_v47, %v779_v48 }
  0x1b   : > { %566 = vmatpush.bf16.msra.mxu2 %v814_v31  ;;  %581 = vmatpush.bf16.msra.mxu3 %v926_v32  ;;  %v761_v55 = vld [vmem:[%s1050_s17 + $0x40] sm:$0xf]  ;;  %v894_v57 = vor.u32 %v984_v49, %v891_v50  ;;  %v954_v58 = vld [vmem:[%s1050_s17 + $0x4c] sm:$0xf0]  ;;  %v952_v59 = vld [vmem:[%s1050_s17 + $0x44] sm:$0xf]  ;;  %v874_v1 = vor.u32 %v982_v54, %v873_v53 }
  0x1c   : > { %v763_v60 = vld [vmem:[%s1050_s17 + $0x50] sm:$0xf0]  ;;  %v980_v61 = vld [vmem:[%s1050_s17 + $0x124] sm:$0xf]  ;;  %v227_v63 = vld [vmem:[%s1050_s17 + $0x1a8] sm:$0xff]  ;;  %v762_v2 = vor.u32 %v954_v58, %v761_v55 }
  0x1d   : > { %v875_v62 = vld [vmem:[%s1050_s17 + $0x130] sm:$0xf0]  ;;  %v409_v0 = vunpack.c.l.b16 %v227_v63  ;;  %v857_v3 = vld [vmem:[%s1050_s17 + $0x100] sm:$0xf]  ;;  %v978_v4 = vld [vmem:[%s1050_s17 + $0x10c] sm:$0xf0]  ;;  %v766_v5 = vor.u32 %v952_v59, %v763_v60  ;;  %v410_v22 = vunpack.c.h.b16 %v227_v63 }
  0x1e   : > { %554 = vmatpush.bf16.msra.mxu1 %v906_v39  ;;  %539 = vmatpush.bf16.msra.mxu0 %v794_v40  ;;  %v878_v6 = vor.u32 %v980_v61, %v875_v62  ;;  %v745_v7 = vld [vmem:[%s1050_s17 + $0x20] sm:$0xf]  ;;  %v950_v8 = vld [vmem:[%s1050_s17 + $0x2c] sm:$0xf0]  ;;  %v948_v9 = vld [vmem:[%s1050_s17 + $0x24] sm:$0xf]  ;;  %v858_v17 = vor.u32 %v978_v4, %v857_v3 }
  0x1f   : > { %567 = vmatpush.bf16.msra.mxu2 %v798_v43  ;;  %582 = vmatpush.bf16.msra.mxu3 %v910_v44  ;;  %v747_v10 = vld [vmem:[%s1050_s17 + $0x30] sm:$0xf0]  ;;  %v976_v11 = vld [vmem:[%s1050_s17 + $0x104] sm:$0xf]  ;;  %v849_v13 = vld [vmem:[%s1050_s17 + $0xe8] sm:$0xf]  ;;  %v465_v15 = vpack.c.b16 %v409_v0, %v409_v0  ;;  %v746_v18 = vor.u32 %v950_v8, %v745_v7  ;;  %v466_v36 = vpack.c.b16 %v410_v22, %v410_v22 }
  0x20   : > { %v859_v12 = vld [vmem:[%s1050_s17 + $0x110] sm:$0xf0]  ;;  %v975_v14 = vld [vmem:[%s1050_s17 + $0xf4] sm:$0xf0]  ;;  %v729_v16 = vld [vmem:[%s1050_s17] sm:$0xf]  ;;  %v750_v23 = vor.u32 %v948_v9, %v747_v10 }
  0x21   : > { %v946_v19 = vld [vmem:[%s1050_s17 + $0xc] sm:$0xf0]  ;;  %v944_v20 = vld [vmem:[%s1050_s17 + $0x4] sm:$0xf]  ;;  %v731_v21 = vld [vmem:[%s1050_s17 + $0x10] sm:$0xf0]  ;;  %v862_v24 = vor.u32 %v976_v11, %v859_v12  ;;  %v850_v28 = vor.u32 %v975_v14, %v849_v13 }
  0x22   : > { %555 = vmatpush.bf16.msra.mxu1 %v890_v51  ;;  %540 = vmatpush.bf16.msra.mxu0 %v778_v52  ;;  %v833_v25 = vld [vmem:[%s1050_s17 + $0xc8] sm:$0xf]  ;;  %v942_v26 = vld [vmem:[%s1213_s0 + $0x4] sm:$0xf]  ;;  %v723_v27 = vld [vmem:[%s1213_s0 + $0x8] sm:$0xf0]  ;;  %v730_v35 = vor.u32 %v946_v19, %v729_v16  ;;  %v734_v38 = vor.u32 %v944_v20, %v731_v21 }
  0x23   : > { %568 = vmatpush.bf16.msra.mxu2 %v782_v56  ;;  %583 = vmatpush.bf16.msra.mxu3 %v894_v57  ;;  %v971_v29 = vld [vmem:[%s1050_s17 + $0xd4] sm:$0xf0]  ;;  %v973_v30 = vld [vmem:[%s1050_s17 + $0xec] sm:$0xf]  ;;  %v851_v31 = vld [vmem:[%s1050_s17 + $0xf8] sm:$0xf0]  ;;  %v1123_v37 = vor.u32 %v942_v26, %v723_v27 }
  0x24   : > { %v531_v32 = vsel %vm523_vm0, %v465_v15, 0  ;;  %v929_v33 = vld [vmem:[%s1050_s17 + $0x188] sm:$0xf]  ;;  %v995_v34 = vld [vmem:[%s1050_s17 + $0x194] sm:$0xf0]  ;;  %v854_v39 = vor.u32 %v973_v30, %v851_v31  ;;  %v834_v42 = vor.u32 %v971_v29, %v833_v25  ;;  %v534_v50 = vsel %vm523_vm0, %v466_v36, 0 }
  0x25   : > { %v721_v40 = vld [vmem:[%s1213_s0] sm:$0xf]  ;;  %v943_v41 = vld [vmem:[%s1213_s0 + $0x4] sm:$0xf0]  ;;  %v930_v43 = vor.u32 %v995_v34, %v929_v33  ;;  %v969_v45 = vld [vmem:[%s1050_s17 + $0xcc] sm:$0xf] }
  0x26   : > { %556 = vmatpush.bf16.msra.mxu1 %v874_v1  ;;  %541 = vmatpush.bf16.msra.mxu0 %v762_v2  ;;  %v817_v44 = vld [vmem:[%s1050_s17 + $0xa8] sm:$0xf]  ;;  %v835_v46 = vld [vmem:[%s1050_s17 + $0xd8] sm:$0xf0]  ;;  %v967_v47 = vld [vmem:[%s1050_s17 + $0xb4] sm:$0xf0]  ;;  %v1140_v51 = vor.u32 %v943_v41, %v721_v40 }
  0x27   : > { %569 = vmatpush.bf16.msra.mxu2 %v766_v5  ;;  %584 = vmatpush.bf16.msra.mxu3 %v878_v6  ;;  %v913_v48 = vld [vmem:[%s1050_s17 + $0x168] sm:$0xf]  ;;  %v991_v49 = vld [vmem:[%s1050_s17 + $0x174] sm:$0xf0]  ;;  %v993_v52 = vld [vmem:[%s1050_s17 + $0x18c] sm:$0xf]  ;;  %v838_v54 = vor.u32 %v969_v45, %v835_v46  ;;  %v818_v56 = vor.u32 %v967_v47, %v817_v44 }
  0x28   : > { %v931_v53 = vld [vmem:[%s1050_s17 + $0x198] sm:$0xf0]  ;;  %v801_v55 = vld [vmem:[%s1050_s17 + $0x88] sm:$0xf]  ;;  %v914_v57 = vor.u32 %v991_v49, %v913_v48  ;;  %v965_v58 = vld [vmem:[%s1050_s17 + $0xac] sm:$0xf] }
  0x29   : > { %v819_v59 = vld [vmem:[%s1050_s17 + $0xb8] sm:$0xf0]  ;;  %v228_v60 = vld [vmem:[%s1214_s1] sm:$0xff]  ;;  %v934_v61 = vor.u32 %v993_v52, %v931_v53  ;;  %v963_v62 = vld [vmem:[%s1050_s17 + $0x94] sm:$0xf0]  ;;  %v1015_v3 = vmov 0  }
  0x2a   : > { %557 = vmatpush.bf16.msra.mxu1 %v858_v17  ;;  %542 = vmatpush.bf16.msra.mxu0 %v746_v18  ;;  %v897_v63 = vld [vmem:[%s1050_s17 + $0x148] sm:$0xf]  ;;  %v987_v0 = vld [vmem:[%s1050_s17 + $0x154] sm:$0xf0]  ;;  %v989_v1 = vld [vmem:[%s1050_s17 + $0x16c] sm:$0xf]  ;;  %v822_v4 = vor.u32 %v965_v58, %v819_v59  ;;  %v802_v5 = vor.u32 %v963_v62, %v801_v55 }
  0x2b   : > { %570 = vmatpush.bf16.msra.mxu2 %v750_v23  ;;  %585 = vmatpush.bf16.msra.mxu3 %v862_v24  ;;  %v915_v2 = vld [vmem:[%s1050_s17 + $0x178] sm:$0xf0]  ;;  %v898_v6 = vor.u32 %v987_v0, %v897_v63  ;;  %v785_v7 = vld [vmem:[%s1050_s17 + $0x68] sm:$0xf]  ;;  %v961_v8 = vld [vmem:[%s1050_s17 + $0x8c] sm:$0xf] }
  0x2c   : > { %1006 = vset.pattern.permute.xlu0 %v1015_v3  ;;  %v803_v9 = vld [vmem:[%s1050_s17 + $0x98] sm:$0xf0]  ;;  %v918_v10 = vor.u32 %v989_v1, %v915_v2  ;;  %v959_v11 = vld [vmem:[%s1050_s17 + $0x74] sm:$0xf0]  ;;  %v881_v12 = vld [vmem:[%s1050_s17 + $0x128] sm:$0xf] }
  0x2d   : > { %935 = vmatmul.msk.bf16.vlgmr.msra.gmra.mxu1 %vm519_vm1, %v1123_v37  ;;  %232 = vperm.xlu0 %1006, %v228_v60   ;;  %v983_v13 = vld [vmem:[%s1050_s17 + $0x134] sm:$0xf0]  ;;  %v985_v14 = vld [vmem:[%s1050_s17 + $0x14c] sm:$0xf]  ;;  %v899_v15 = vld [vmem:[%s1050_s17 + $0x158] sm:$0xf0]  ;;  %v806_v16 = vor.u32 %v961_v8, %v803_v9  ;;  %v786_v18 = vor.u32 %v959_v11, %v785_v7 }
  0x2e   : > { %592 = vmatpush.bf16.msrb.mxu1 %v850_v28  ;;  %543 = vmatpush.bf16.msra.mxu0 %v730_v35  ;;  %v769_v17 = vld [vmem:[%s1050_s17 + $0x48] sm:$0xf]  ;;  %v882_v19 = vor.u32 %v983_v13, %v881_v12  ;;  %v957_v20 = vld [vmem:[%s1050_s17 + $0x6c] sm:$0xf]  ;;  %v787_v21 = vld [vmem:[%s1050_s17 + $0x78] sm:$0xf0]  ;;  %v902_v23 = vor.u32 %v985_v14, %v899_v15 }
  0x2f   : > { %608 = vmatpush.bf16.msrb.mxu3 %v531_v32  ;;  %571 = vmatpush.bf16.msra.mxu2 %v734_v38  ;;  %v229_v22 = vld [vmem:[%s1214_s1 + $0x8] sm:$0xff]  ;;  %v955_v24 = vld [vmem:[%s1050_s17 + $0x54] sm:$0xf0]  ;;  %v883_v28 = vld [vmem:[%s1050_s17 + $0x138] sm:$0xf0]  ;;  %v790_v29 = vor.u32 %v957_v20, %v787_v21 }
  0x30   : > { %936 = vmatmul.msk.bf16.vlgmr.msra.gmra.mxu3 %vm519_vm1, %v1123_v37  ;;  %v865_v25 = vld [vmem:[%s1050_s17 + $0x108] sm:$0xf]  ;;  %v979_v26 = vld [vmem:[%s1050_s17 + $0x114] sm:$0xf0]  ;;  %v981_v27 = vld [vmem:[%s1050_s17 + $0x12c] sm:$0xf]  ;;  %v770_v30 = vor.u32 %v955_v24, %v769_v17 }
  0x31   : > { %544 = vmatmul.bf16.vlgmr.msra.gmra.mxu0 %v1140_v51  ;;  %v866_v31 = vor.u32 %v979_v26, %v865_v25  ;;  %v953_v32 = vld [vmem:[%s1050_s17 + $0x4c] sm:$0xf]  ;;  %v771_v33 = vld [vmem:[%s1050_s17 + $0x58] sm:$0xf0]  ;;  %v886_v34 = vor.u32 %v981_v27, %v883_v28  ;;  %v753_v35 = vld [vmem:[%s1050_s17 + $0x28] sm:$0xf] }
  0x32   : > { %620 = vmatpush.bf16.msrb.mxu0 %v854_v39  ;;  %593 = vmatpush.bf16.msrb.mxu1 %v834_v42  ;;  %v951_v36 = vld [vmem:[%s1050_s17 + $0x34] sm:$0xf0]  ;;  %v977_v38 = vld [vmem:[%s1050_s17 + $0x10c] sm:$0xf]  ;;  %v867_v39 = vld [vmem:[%s1050_s17 + $0x118] sm:$0xf0]  ;;  %v774_v40 = vor.u32 %v953_v32, %v771_v33 }
  0x33   : > { %609 = vmatpush.bf16.msrb.mxu3 %v930_v43  ;;  %636 = vmatpush.bf16.msrb.mxu2 %v534_v50  ;;  %v754_v41 = vor.u32 %v951_v36, %v753_v35  ;;  %v949_v42 = vld [vmem:[%s1050_s17 + $0x2c] sm:$0xf]  ;;  %v755_v43 = vld [vmem:[%s1050_s17 + $0x38] sm:$0xf0]  ;;  %v870_v44 = vor.u32 %v977_v38, %v867_v39  ;;  %v737_v45 = vld [vmem:[%s1050_s17 + $0x8] sm:$0xf] }
  0x34   : > { %572 = vmatmul.bf16.vlgmr.msra.gmra.mxu2 %v1140_v51  ;;  %v947_v46 = vld [vmem:[%s1050_s17 + $0x14] sm:$0xf0]  ;;  %v758_v47 = vor.u32 %v949_v42, %v755_v43  ;;  %v945_v49 = vld [vmem:[%s1050_s17 + $0xc] sm:$0xf]  ;;  %v739_v50 = vld [vmem:[%s1050_s17 + $0x18] sm:$0xf0] }
  0x35   : > { %237 = vperm.xlu0 %1006, %v229_v22   ;;  %v738_v48 = vor.u32 %v947_v46, %v737_v45  ;;  %v742_v52 = vor.u32 %v945_v49, %v739_v50 }
  0x36   : > { %621 = vmatpush.bf16.msrb.mxu0 %v838_v54  ;;  %594 = vmatpush.bf16.msrb.mxu1 %v818_v56 }
  0x37   : > { %610 = vmatpush.bf16.msrb.mxu3 %v914_v57  ;;  %637 = vmatpush.bf16.msrb.mxu2 %v934_v61 }
  0x3a   : > { %622 = vmatpush.bf16.msrb.mxu0 %v822_v4  ;;  %595 = vmatpush.bf16.msrb.mxu1 %v802_v5 }
  0x3b   : > { %611 = vmatpush.bf16.msrb.mxu3 %v898_v6  ;;  %638 = vmatpush.bf16.msrb.mxu2 %v918_v10 }
  0x3e   : > { %623 = vmatpush.bf16.msrb.mxu0 %v806_v16  ;;  %596 = vmatpush.bf16.msrb.mxu1 %v786_v18 }
  0x3f   : > { %612 = vmatpush.bf16.msrb.mxu3 %v882_v19  ;;  %639 = vmatpush.bf16.msrb.mxu2 %v902_v23 }
  0x42   : > { %624 = vmatpush.bf16.msrb.mxu0 %v790_v29  ;;  %597 = vmatpush.bf16.msrb.mxu1 %v770_v30 }
  0x43   : > { %613 = vmatpush.bf16.msrb.mxu3 %v866_v31  ;;  %640 = vmatpush.bf16.msrb.mxu2 %v886_v34 }
  0x46   : > { %937 = vmatmul.msk.bf16.vlgmr.msrb.gmra.mxu3 %vm519_vm1, %v1123_v37  ;;  %625 = vmatpush.bf16.msrb.mxu0 %v774_v40 }
  0x47   : > { %598 = vmatpush.bf16.msrb.mxu1 %v754_v41  ;;  %641 = vmatpush.bf16.msrb.mxu2 %v870_v44 }
  0x4a   : > { %626 = vmatpush.bf16.msrb.mxu0 %v758_v47  ;;  %938 = vmatmul.msk.bf16.vlgmr.msrb.gmra.mxu2 %vm519_vm1, %v1123_v37 }
  0x4b   : > { %599 = vmatpush.bf16.msrb.mxu1 %v738_v48 }
  0x4e   : > { %600 = vmatmul.bf16.vlgmr.msrb.gmra.mxu1 %v1140_v51  ;;  %627 = vmatpush.bf16.msrb.mxu0 %v742_v52 }
  0x51   : > { %628 = vmatmul.bf16.vlgmr.msrb.gmra.mxu0 %v1140_v51 }
  0x9f   : > { %v233_v53 = vpop.permute.xlu0 %232 }
  0xa7   : > { %v238_v58 = vpop.permute.xlu0 %237 }
  0xaa   : > { %v559_v54 = vpop.f32.mrf.mxu1 }
  0xae   : > { %v545_v55 = vpop.f32.mrf.mxu0 }
  0xaf   : > { %v546_v56 = vadd.f32 %v545_v55, %v233_v53 }
  0xb1   : > { %v560_v57 = vadd.f32 %v559_v54, %v546_v56 }
  0xb2   : > { %v561_v61 = vpop.f32.mrf.mxu1 }
  0xb3   : > { %648 = vst [vmem:[%s1200_s6] sm:$0xff] %v560_v57  ;;  %v587_v37 = vpop.f32.mrf.mxu3 }
  0xb6   : > { %v547_v60 = vpop.f32.mrf.mxu0 }
  0xb7   : > { %v573_v59 = vpop.f32.mrf.mxu2  ;;  %v548_v62 = vadd.f32 %v547_v60, %v238_v58 }
  0xb8   : > { %v574_v51 = vadd.f32 %v573_v59, %v233_v53 }
  0xb9   : > { %v562_v0 = vadd.f32 %v561_v61, %v548_v62 }
  0xba   : > { %v588_v63 = vadd.f32 %v587_v37, %v574_v51 }
  0xbb   : > { %652 = vst [vmem:[%s1200_s6 + $0x20] sm:$0xff] %v562_v0  ;;  %v589_v2 = vpop.f32.mrf.mxu3 }
  0xbc   : > { %649 = vst [vmem:[%s1200_s6 + $0x8] sm:$0xff] %v588_v63 }
  0xbf   : > { %v575_v1 = vpop.f32.mrf.mxu2 }
  0xc0   : > { %v576_v3 = vadd.f32 %v575_v1, %v238_v58 }
  0xc2   : > { %v590_v4 = vadd.f32 %v589_v2, %v576_v3 }
  0xc4   : > { %653 = vst [vmem:[%s1200_s6 + $0x28] sm:$0xff] %v590_v4 }
  0xc9   : > { %v615_v5 = vpop.f32.mrf.mxu3 }
  0xcb   : > { %v601_v6 = vpop.f32.mrf.mxu1 }
  0xcc   : > { %v602_v7 = vadd.f32 %v601_v6, %v233_v53 }
  0xcd   : > { %v643_v9 = vpop.f32.mrf.mxu2 }
  0xce   : > { %v616_v8 = vadd.f32 %v615_v5, %v602_v7  ;;  %v629_v10 = vpop.f32.mrf.mxu0 }
  0xcf   : > { %v630_v11 = vadd.f32 %v629_v10, %v233_v53 }
  0xd0   : > { %650 = vst [vmem:[%s1200_s6 + $0x10] sm:$0xff] %v616_v8 }
  0xd1   : > { %v644_v12 = vadd.f32 %v643_v9, %v630_v11  ;;  %v617_v15 = vpop.f32.mrf.mxu3 }
  0xd3   : > { %651 = vst [vmem:[%s1200_s6 + $0x18] sm:$0xff] %v644_v12  ;;  %v603_v13 = vpop.f32.mrf.mxu1 }
  0xd4   : > { %v604_v14 = vadd.f32 %v603_v13, %v238_v58 }
  0xd5   : > { %v645_v19 = vpop.f32.mrf.mxu2 }
  0xd6   : > { %v618_v16 = vadd.f32 %v617_v15, %v604_v14  ;;  %v631_v17 = vpop.f32.mrf.mxu0 }
  0xd7   : > { %v632_v18 = vadd.f32 %v631_v17, %v238_v58 }
  0xd8   : > { %654 = vst [vmem:[%s1200_s6 + $0x30] sm:$0xff] %v618_v16 }
  0xd9   : > { %v646_v20 = vadd.f32 %v645_v19, %v632_v18 }
  0xdb   : > { %655 = vst [vmem:[%s1200_s6 + $0x38] sm:$0xff] %v646_v20 }
  0xdc PF: > { %s13_s12 = sadd.s32 1, %s1013_s12  }
  0xdd   : > { %p10_p4 = scmp.ge.s32.totalorder %s13_s12, 4  }
  0xdf   :  { %12 = sbr.rel (!%p10_p4) target bundleno = 1 (0x1), region = 62 }

</bundles_post_ra>
